<compile_context>
chip_gen: v7x
topology: tpu7x:2x2x1
jax: 0.10.0
libtpu: 0.0.40
codegen_flags: <defaults>
</compile_context>

<pallas_src>
import functools

import jax
import jax.numpy as jnp
from jax.experimental import pallas as pl
from jax.experimental.pallas import tpu as pltpu

VMEM_LIMIT = 32 * 1024 * 1024
H = 256


def _round_up(x, m):
    return ((x + m - 1) // m) * m


def _block_diag(a, b):
    ka, na = a.shape
    kb, nb = b.shape
    top = jnp.concatenate([a, jnp.zeros((ka, nb), a.dtype)], axis=1)
    bot = jnp.concatenate([jnp.zeros((kb, na), b.dtype), b], axis=1)
    return jnp.concatenate([top, bot], axis=0)


# ----------------------------------------------------------------------------
# Generic fused linear kernel:  out = act(x @ w + b)
# Single-K-tile fast path writes the output once; multi-K path accumulates into
# the resident output block.
# ----------------------------------------------------------------------------
def _linear_kernel_single(x_ref, w_ref, b_ref, o_ref, *, activation):
    res = jnp.dot(x_ref[...], w_ref[...], preferred_element_type=jnp.float32) + b_ref[...]
    if activation == "relu":
        res = jnp.maximum(res, 0.0)
    o_ref[...] = res


def _linear_kernel_multi(x_ref, w_ref, b_ref, o_ref, *, activation):
    k = pl.program_id(1)

    @pl.when(k == 0)
    def _():
        o_ref[...] = jnp.zeros_like(o_ref)

    o_ref[...] += jnp.dot(x_ref[...], w_ref[...], preferred_element_type=jnp.float32)

    @pl.when(k == pl.num_programs(1) - 1)
    def _():
        res = o_ref[...] + b_ref[...]
        if activation == "relu":
            res = jnp.maximum(res, 0.0)
        o_ref[...] = res


def linear_pallas(x, w, b=None, activation=None, *, tm=256, tk=512):
    """x: (M, K) f32, w: (K, N) f32 -> (M, N) f32."""
    M, K = x.shape
    Kw, N = w.shape
    assert K == Kw, (K, Kw)
    if b is None:
        b = jnp.zeros((1, N), jnp.float32)
    tm_eff = tm if M >= tm else _round_up(M, 8)
    Mp = _round_up(M, tm_eff)
    xp = x.astype(jnp.float32)
    if Mp != M:
        xp = jnp.pad(xp, ((0, Mp - M), (0, 0)))
    nm = Mp // tm_eff

    if K > tk and K % tk == 0:
        nk = K // tk
        out = pl.pallas_call(
            functools.partial(_linear_kernel_multi, activation=activation),
            out_shape=jax.ShapeDtypeStruct((Mp, N), jnp.float32),
            grid_spec=pltpu.PrefetchScalarGridSpec(
                num_scalar_prefetch=0,
                grid=(nm, nk),
                in_specs=[
                    pl.BlockSpec((tm_eff, tk), lambda i, k: (i, k)),
                    pl.BlockSpec((tk, N), lambda i, k: (k, 0)),
                    pl.BlockSpec((1, N), lambda i, k: (0, 0)),
                ],
                out_specs=pl.BlockSpec((tm_eff, N), lambda i, k: (i, 0)),
            ),
            compiler_params=pltpu.CompilerParams(
                dimension_semantics=("parallel", "arbitrary"),
                vmem_limit_bytes=VMEM_LIMIT),
        )(xp, w.astype(jnp.float32), b.astype(jnp.float32))
    else:
        out = pl.pallas_call(
            functools.partial(_linear_kernel_single, activation=activation),
            out_shape=jax.ShapeDtypeStruct((Mp, N), jnp.float32),
            grid_spec=pltpu.PrefetchScalarGridSpec(
                num_scalar_prefetch=0,
                grid=(nm,),
                in_specs=[
                    pl.BlockSpec((tm_eff, K), lambda i: (i, 0)),
                    pl.BlockSpec((K, N), lambda i: (0, 0)),
                    pl.BlockSpec((1, N), lambda i: (0, 0)),
                ],
                out_specs=pl.BlockSpec((tm_eff, N), lambda i: (i, 0)),
            ),
            compiler_params=pltpu.CompilerParams(
                dimension_semantics=("parallel",),
                vmem_limit_bytes=VMEM_LIMIT),
        )(xp, w.astype(jnp.float32), b.astype(jnp.float32))
    return out[:M]


# ----------------------------------------------------------------------------
# Fused Prenet + attention-GRU input-gate precompute (batched over all steps):
#   gx = relu(relu(x@W1+b1)@W2+b2) @ Wih_x + b_ih
# ----------------------------------------------------------------------------
def _prenet_gates_kernel(x_ref, w1_ref, b1_ref, w2_ref, b2_ref, wg_ref, bg_ref, o_ref):
    h1 = jnp.maximum(
        jnp.dot(x_ref[...], w1_ref[...], preferred_element_type=jnp.float32) + b1_ref[...], 0.0)
    h2 = jnp.maximum(
        jnp.dot(h1, w2_ref[...], preferred_element_type=jnp.float32) + b2_ref[...], 0.0)
    o_ref[...] = jnp.dot(h2, wg_ref[...], preferred_element_type=jnp.float32) + bg_ref[...]


def prenet_gates_pallas(x, w1, b1, w2, b2, wg, bg, *, tm=256):
    M, K = x.shape
    assert K == w1.shape[0]
    N = wg.shape[1]
    tm_eff = tm if M >= tm else _round_up(M, 8)
    Mp = _round_up(M, tm_eff)
    xp = x.astype(jnp.float32)
    if Mp != M:
        xp = jnp.pad(xp, ((0, Mp - M), (0, 0)))
    nm = Mp // tm_eff

    out = pl.pallas_call(
        _prenet_gates_kernel,
        out_shape=jax.ShapeDtypeStruct((Mp, N), jnp.float32),
        grid_spec=pltpu.PrefetchScalarGridSpec(
            num_scalar_prefetch=0,
            grid=(nm,),
            in_specs=[
                pl.BlockSpec((tm_eff, K), lambda i: (i, 0)),
                pl.BlockSpec((K, 256), lambda i: (0, 0)),
                pl.BlockSpec((1, 256), lambda i: (0, 0)),
                pl.BlockSpec((256, 128), lambda i: (0, 0)),
                pl.BlockSpec((1, 128), lambda i: (0, 0)),
                pl.BlockSpec((128, N), lambda i: (0, 0)),
                pl.BlockSpec((1, N), lambda i: (0, 0)),
            ],
            out_specs=pl.BlockSpec((tm_eff, N), lambda i: (i, 0)),
        ),
        compiler_params=pltpu.CompilerParams(
            dimension_semantics=("parallel",),
            vmem_limit_bytes=VMEM_LIMIT),
    )(xp, w1, b1, w2, b2, wg, bg)
    return out[:M]


# ----------------------------------------------------------------------------
# The sequential decoder recurrence, chunked: grid=(T_dec_pad//CHUNK,), CHUNK
# timesteps unrolled per grid iteration.  All weights + encoder memory are
# resident (bf16); recurrent state lives in f32 VMEM scratch across grid steps.
# ----------------------------------------------------------------------------
def _decoder_loop_kernel(
        gx_ref, watt_ref, bhh_a_ref, wq_ref, v_ref, pmem_ref, mem_ref,
        wvq_ctx_ref, wvq_lat_ref, vqb_ref, lat_ref,
        wpd_ref, bpd_ref, wdec_ref, bih_d_ref, bhh_d_ref, wmel_ref, bmel_ref,
        mel_ref, align_ref,
        h_att_ref, attn_ref, h_dec_ref, lat_proj_ref,
        *, t_enc, tp, batch, chunk, bp):
    @pl.when(pl.program_id(0) == 0)
    def _():
        h_att_ref[...] = jnp.zeros_like(h_att_ref)
        attn_ref[...] = jnp.zeros_like(attn_ref)
        h_dec_ref[...] = jnp.zeros_like(h_dec_ref)
        # VQ latent half of project_attnNlatent_to_attn — constant over time, fused here
        # instead of a standalone pallas_call.
        lat_proj_ref[...] = (
            jnp.dot(lat_ref[...].astype(jnp.bfloat16), wvq_lat_ref[...],
                    preferred_element_type=jnp.float32) + vqb_ref[...])

    for s in range(chunk):
        h_att = h_att_ref[...]           # (Bp, 256) f32
        attn = attn_ref[...]             # (Bp, 256) f32

        # ---- attention GRU cell: ONE block-diagonal matmul gives [attn@W_ih | h@W_hh] ----
        xh = jnp.concatenate([attn, h_att], axis=-1).astype(jnp.bfloat16)     # (Bp, 512)
        g = jnp.dot(xh, watt_ref[...], preferred_element_type=jnp.float32)    # (Bp, 1536)
        gi = gx_ref[s] + g[:, :3 * H]                                          # prenet part + b_ih in gx
        gh = g[:, 3 * H:] + bhh_a_ref[...]
        r = jax.nn.sigmoid(gi[:, :H] + gh[:, :H])
        z = jax.nn.sigmoid(gi[:, H:2 * H] + gh[:, H:2 * H])
        n = jnp.tanh(gi[:, 2 * H:] + r * gh[:, 2 * H:])
        h_att = (1.0 - z) * n + z * h_att

        # ---- Bahdanau attention: MXU score rows, row softmax, MXU context ----
        pq = jnp.dot(h_att.astype(jnp.bfloat16), wq_ref[...],
                     preferred_element_type=jnp.float32)                       # (Bp, 256)
        score_rows = []
        for b in range(batch):
            e_b = jnp.tanh(pmem_ref[b] + pq[b:b + 1, :])                       # (Tp, 256) f32
            # v (1,256) · e_b (Tp,256) contracting on the feature dim -> (1, Tp)
            score_rows.append(
                jax.lax.dot_general(v_ref[...], e_b.astype(jnp.bfloat16),
                                    (((1,), (1,)), ((), ())),
                                    preferred_element_type=jnp.float32))
        scores = jnp.concatenate(score_rows, axis=0)                           # (batch, Tp)
        if tp != t_enc:                                                        # mask only Tp padding
            col_ids = jax.lax.broadcasted_iota(jnp.int32, (1, tp), 1)
            scores = jnp.where(col_ids < t_enc, scores, -1e30)
        scores = scores - jnp.max(scores, axis=-1, keepdims=True)
        w_exp = jnp.exp(scores)
        a_mat = w_exp * pl.reciprocal(jnp.sum(w_exp, axis=-1, keepdims=True), approx=True)
        if bp > batch:
            align_full = jnp.concatenate(
                [a_mat, jnp.zeros((bp - batch, tp), jnp.float32)], axis=0)
        else:
            align_full = a_mat
        align_ref[s] = align_full                                              # lane-dense write

        ctx_rows = [jnp.dot(a_mat[b:b + 1, :].astype(jnp.bfloat16), mem_ref[b],
                            preferred_element_type=jnp.float32)
                    for b in range(batch)]                                     # (1, 256) each
        if bp > batch:
            ctx_rows.append(jnp.zeros((bp - batch, H), jnp.float32))
        ctx = jnp.concatenate(ctx_rows, axis=0)                                # (Bp, 256)

        # ---- VQ latent fusion: tanh(W_vq [ctx ; latent] + b) (latent half precomputed) ----
        attn_new = jnp.tanh(
            jnp.dot(ctx.astype(jnp.bfloat16), wvq_ctx_ref[...],
                    preferred_element_type=jnp.float32) + lat_proj_ref[...])

        # ---- project [h_att ; attn_new] to decoder input (fused (512,256) weight) ----
        dec_in = jnp.dot(jnp.concatenate([h_att, attn_new], axis=-1).astype(jnp.bfloat16),
                         wpd_ref[...], preferred_element_type=jnp.float32) + bpd_ref[...]

        # ---- two residual decoder GRU cells (one block-diag matmul each) ----
        for i in range(2):
            h_i = h_dec_ref[i]
            xh_d = jnp.concatenate([dec_in, h_i], axis=-1).astype(jnp.bfloat16)
            g_d = jnp.dot(xh_d, wdec_ref[i], preferred_element_type=jnp.float32)
            gi_d = g_d[:, :3 * H] + bih_d_ref[i]
            gh_d = g_d[:, 3 * H:] + bhh_d_ref[i]
            r_d = jax.nn.sigmoid(gi_d[:, :H] + gh_d[:, :H])
            z_d = jax.nn.sigmoid(gi_d[:, H:2 * H] + gh_d[:, H:2 * H])
            n_d = jnp.tanh(gi_d[:, 2 * H:] + r_d * gh_d[:, 2 * H:])
            h_new = (1.0 - z_d) * n_d + z_d * h_i
            h_dec_ref[i] = h_new
            dec_in = h_new + dec_in

        # ---- mel projection + state writeback ----
        mel_ref[s] = jnp.dot(dec_in.astype(jnp.bfloat16), wmel_ref[...],
                             preferred_element_type=jnp.float32) + bmel_ref[...]
        h_att_ref[...] = h_att
        attn_ref[...] = attn_new


# ----------------------------------------------------------------------------
# Parameters (deterministic synthetic init, kernel layout: x @ W, pre-padded,
# decoder-loop weights stored bf16 and block-diag fused)
# ----------------------------------------------------------------------------
def init_params(key, in_dim, r):
    d_mel = in_dim * r
    dm_pad = _round_up(d_mel, 128)
    it = iter(jax.random.split(key, 32))

    def nrm(shape, fan_in):
        return (jax.random.normal(next(it), shape) / (fan_in ** 0.5)).astype(jnp.float32)

    p = {"D_mel": d_mel, "Dm_pad": dm_pad}
    # memory_layer: Linear(256, 256, bias=False)
    p["w_mem"] = nrm((256, 256), 256)
    # Prenet: Linear(d_mel, 256) -> Linear(256, 128)   (input dim padded to 128-multiple)
    p["pre_w1"] = jnp.zeros((dm_pad, 256), jnp.float32).at[:d_mel].set(nrm((d_mel, 256), d_mel))
    p["pre_b1"] = jnp.zeros((1, 256), jnp.float32)
    p["pre_w2"] = nrm((256, 128), 256)
    p["pre_b2"] = jnp.zeros((1, 128), jnp.float32)
    # attention GRUCell(384, 256): W_ih split into prenet(128) / attention(256) halves.
    p["att_wih_x"] = nrm((128, 768), 384)
    p["att_bih"] = jnp.zeros((1, 768), jnp.float32)
    att_wih_a = nrm((256, 768), 384)
    att_whh = nrm((256, 768), 256)
    p["att_w_bd"] = _block_diag(att_wih_a, att_whh).astype(jnp.bfloat16)   # (512, 1536)
    p["att_bhh"] = jnp.zeros((1, 768), jnp.float32)
    # BahdanauAttention(256)
    p["att_wq"] = nrm((256, 256), 256).astype(jnp.bfloat16)
    p["att_v"] = nrm((1, 256), 256).astype(jnp.bfloat16)
    # project_attnNlatent_to_attn: Linear(512, 256) split into ctx / latent halves
    p["vq_w_ctx"] = nrm((256, 256), 512).astype(jnp.bfloat16)
    p["vq_w_lat"] = nrm((256, 256), 512).astype(jnp.bfloat16)
    p["vq_b"] = jnp.zeros((1, 256), jnp.float32)
    # project_to_decoder_in: Linear(512, 256), [h_att ; attn] halves fused
    p["pd_w"] = jnp.concatenate([nrm((256, 256), 512), nrm((256, 256), 512)],
                                axis=0).astype(jnp.bfloat16)               # (512, 256)
    p["pd_b"] = jnp.zeros((1, 256), jnp.float32)
    # 2 decoder GRUCell(256, 256): block-diag [W_ih ; W_hh] per cell
    dec_bd = [_block_diag(nrm((256, 768), 256), nrm((256, 768), 256)) for _ in range(2)]
    p["dec_w_bd"] = jnp.stack(dec_bd).astype(jnp.bfloat16)                 # (2, 512, 1536)
    p["dec_bih"] = jnp.zeros((2, 1, 768), jnp.float32)
    p["dec_bhh"] = jnp.zeros((2, 1, 768), jnp.float32)
    # proj_to_mel: Linear(256, in_dim*r), output columns padded to 128-multiple
    p["mel_w"] = (jnp.zeros((256, dm_pad), jnp.float32)
                  .at[:, :d_mel].set(nrm((256, d_mel), 256))).astype(jnp.bfloat16)
    p["mel_b"] = jnp.zeros((1, dm_pad), jnp.float32)
    return p


# ----------------------------------------------------------------------------
# Full forward pass (teacher forcing, eval mode)
# ----------------------------------------------------------------------------
def decoder_forward(params, encoder_outputs, latent_output, inputs, memory_lengths=None):
    # TODO(synk): greedy decoding (inputs=None, data-dependent stop via is_end_of_frames)
    # and memory_lengths attention masking are not implemented (teacher-forced, mask=None path).
    assert memory_lengths is None
    B, T_enc, E = encoder_outputs.shape
    assert E == 256
    _, T_dec, D_mel = inputs.shape
    assert D_mel == params["D_mel"]
    Dm_pad = params["Dm_pad"]
    Bp = _round_up(B, 8)
    Tp = _round_up(T_enc, 8)
    chunk = T_dec if T_dec < 8 else 8
    T_dec_pad = _round_up(T_dec, chunk)
    nc = T_dec_pad // chunk

    enc = encoder_outputs.astype(jnp.float32)

    # memory_layer over all encoder frames as one batched matmul
    pmem = linear_pallas(enc.reshape(B * T_enc, 256), params["w_mem"]).reshape(B, T_enc, 256)
    pmem_pad = jnp.pad(pmem, ((0, 0), (0, Tp - T_enc), (0, 0))).astype(jnp.bfloat16)
    mem_pad = jnp.pad(enc, ((0, 0), (0, Tp - T_enc), (0, 0))).astype(jnp.bfloat16)

    # Prenet + prenet half of the attention-GRU input gates, for every step at once.
    x0 = jnp.zeros((B, 1, D_mel), jnp.float32)
    pren_in = jnp.concatenate([x0, inputs[:, :T_dec - 1, :].astype(jnp.float32)], axis=1)
    pren_in = jnp.swapaxes(pren_in, 0, 1).reshape(T_dec * B, D_mel)      # time-major
    if Dm_pad != D_mel:
        pren_in = jnp.pad(pren_in, ((0, 0), (0, Dm_pad - D_mel)))
    gx = prenet_gates_pallas(pren_in, params["pre_w1"], params["pre_b1"],
                             params["pre_w2"], params["pre_b2"],
                             params["att_wih_x"], params["att_bih"])
    gx = jnp.pad(gx.reshape(T_dec, B, 768),
                 ((0, T_dec_pad - T_dec), (0, Bp - B), (0, 0)))

    # raw latent, projected once inside the decoder loop at chunk 0
    lat = jnp.pad(latent_output.reshape(B, 256).astype(jnp.float32), ((0, Bp - B), (0, 0)))

    kernel = functools.partial(_decoder_loop_kernel, t_enc=T_enc, tp=Tp,
                               batch=B, chunk=chunk, bp=Bp)
    # TODO(synk): on v7x, mark constant-index weight/memory blocks pipeline_mode=pl.Buffered(1)
    # and split the padded batch across the two TensorCores for larger B.
    mel, align = pl.pallas_call(
        kernel,
        out_shape=(jax.ShapeDtypeStruct((T_dec_pad, Bp, Dm_pad), jnp.float32),
                   jax.ShapeDtypeStruct((T_dec_pad, Bp, Tp), jnp.float32)),
        grid_spec=pltpu.PrefetchScalarGridSpec(
            num_scalar_prefetch=0,
            grid=(nc,),
            in_specs=[
                pl.BlockSpec((chunk, Bp, 768), lambda c: (c, 0, 0)),   # precomputed prenet gates
                pl.BlockSpec((512, 1536), lambda c: (0, 0)),           # att GRU block-diag W (bf16)
                pl.BlockSpec((1, 768), lambda c: (0, 0)),              # att GRU b_hh
                pl.BlockSpec((256, 256), lambda c: (0, 0)),            # Bahdanau Wq (bf16)
                pl.BlockSpec((1, 256), lambda c: (0, 0)),              # Bahdanau v (bf16)
                pl.BlockSpec((B, Tp, 256), lambda c: (0, 0, 0)),       # processed memory (bf16)
                pl.BlockSpec((B, Tp, 256), lambda c: (0, 0, 0)),       # encoder memory (bf16)
                pl.BlockSpec((256, 256), lambda c: (0, 0)),            # VQ W ctx half (bf16)
                pl.BlockSpec((256, 256), lambda c: (0, 0)),            # VQ W latent half (bf16)
                pl.BlockSpec((1, 256), lambda c: (0, 0)),              # VQ bias
                pl.BlockSpec((Bp, 256), lambda c: (0, 0)),             # latent (padded)
                pl.BlockSpec((512, 256), lambda c: (0, 0)),            # proj_to_dec fused W (bf16)
                pl.BlockSpec((1, 256), lambda c: (0, 0)),              # proj_to_dec b
                pl.BlockSpec((2, 512, 1536), lambda c: (0, 0, 0)),     # decoder GRU block-diag W
                pl.BlockSpec((2, 1, 768), lambda c: (0, 0, 0)),        # decoder GRU b_ih
                pl.BlockSpec((2, 1, 768), lambda c: (0, 0, 0)),        # decoder GRU b_hh
                pl.BlockSpec((256, Dm_pad), lambda c: (0, 0)),         # proj_to_mel W (bf16)
                pl.BlockSpec((1, Dm_pad), lambda c: (0, 0)),           # proj_to_mel b
            ],
            out_specs=[
                pl.BlockSpec((chunk, Bp, Dm_pad), lambda c: (c, 0, 0)),
                pl.BlockSpec((chunk, Bp, Tp), lambda c: (c, 0, 0)),
            ],
            scratch_shapes=[
                pltpu.VMEM((Bp, 256), jnp.float32),      # attention GRU hidden
                pltpu.VMEM((Bp, 256), jnp.float32),      # current attention (post-VQ)
                pltpu.VMEM((2, Bp, 256), jnp.float32),   # decoder GRU hiddens
                pltpu.VMEM((Bp, 256), jnp.float32),      # latent projection (constant)
            ],
        ),
        compiler_params=pltpu.CompilerParams(
            dimension_semantics=("arbitrary",),          # sequential recurrence
            vmem_limit_bytes=VMEM_LIMIT),
    )(gx, params["att_w_bd"], params["att_bhh"], params["att_wq"], params["att_v"],
      pmem_pad, mem_pad, params["vq_w_ctx"], params["vq_w_lat"], params["vq_b"], lat,
      params["pd_w"], params["pd_b"], params["dec_w_bd"], params["dec_bih"],
      params["dec_bhh"], params["mel_w"], params["mel_b"])

    outputs = jnp.transpose(mel[:T_dec, :B, :D_mel], (1, 0, 2))        # (B, T_dec, in_dim*r)
    alignments = jnp.transpose(align[:T_dec, :B, :T_enc], (1, 0, 2))   # (B, T_dec, T_enc)
    return outputs, alignments


if __name__ == "__main__":
    key = jax.random.PRNGKey(0)
    in_dim, r = 32, 4                 # mel bins per frame, reduction factor -> prenet in = 128
    B, T_enc, T_dec = 2, 16, 8
    pkey, ekey, lkey, ikey = jax.random.split(key, 4)
    params = init_params(pkey, in_dim, r)
    encoder_outputs = jax.random.normal(ekey, (B, T_enc, 256), dtype=jnp.float32)
    latent_output = jax.random.normal(lkey, (B, 1, 256), dtype=jnp.float32)
    mel_targets = jax.random.normal(ikey, (B, T_dec, in_dim * r), dtype=jnp.float32)

    outputs, alignments = decoder_forward(params, encoder_outputs, latent_output, mel_targets)
    outputs, alignments = jax.block_until_ready((outputs, alignments))

    assert outputs.shape == (B, T_dec, in_dim * r), outputs.shape
    assert alignments.shape == (B, T_dec, T_enc), alignments.shape
    assert bool(jnp.all(jnp.isfinite(outputs)))
    assert bool(jnp.all(jnp.isfinite(alignments)))
    # each alignment row is a softmax distribution over encoder time
    # (5e-3 tolerance: denominator uses the EUP approximate reciprocal)
    assert bool(jnp.all(jnp.abs(jnp.sum(alignments, axis=-1) - 1.0) < 5e-3))
    print("KERNEL_OK")
</pallas_src>

<mosaic_0001>
module attributes {stable_mosaic.version = 11 : i64} {
  func.func @_linear_kernel_single(%arg0: i32, %arg1: memref<32x256xf32, #tpu.memory_space<vmem>>, %arg2: memref<256x256xf32, #tpu.memory_space<vmem>>, %arg3: memref<1x256xf32, #tpu.memory_space<vmem>>, %arg4: memref<32x256xf32, #tpu.memory_space<vmem>>) attributes {dimension_semantics = [#tpu.dimension_semantics<parallel>], iteration_bounds = array<i64: 1>, scalar_prefetch = 0 : i64, scratch_operands = 0 : i64, tpu.core_type = #tpu.core_type<tc>, window_params = [{transform_indices = @transform_0, window_bounds = array<i64: 32, 256>}, {pipeline_mode = #tpu.pipeline_mode<synchronous>, transform_indices = @transform_1, window_bounds = array<i64: 256, 256>}, {pipeline_mode = #tpu.pipeline_mode<synchronous>, transform_indices = @transform_2, window_bounds = array<i64: 1, 256>}, {transform_indices = @transform_3, window_bounds = array<i64: 32, 256>}]} {
    %c0 = arith.constant 0 : index
    %c0_0 = arith.constant 0 : index
    %0 = vector.load %arg1[%c0, %c0_0] : memref<32x256xf32, #tpu.memory_space<vmem>>, vector<32x256xf32>
    %c0_1 = arith.constant 0 : index
    %c0_2 = arith.constant 0 : index
    %1 = vector.load %arg2[%c0_1, %c0_2] : memref<256x256xf32, #tpu.memory_space<vmem>>, vector<256x256xf32>
    %cst = arith.constant dense<0.000000e+00> : vector<32x256xf32>
    %2 = tpu.matmul %0, %1, %cst {dimension_numbers = #tpu.dot_dimension_numbers<[1], [0], [0], [1], [0, 0, 1, 1], [], []>} : vector<32x256xf32>, vector<256x256xf32>, vector<32x256xf32> -> vector<32x256xf32>
    %c0_3 = arith.constant 0 : index
    %c0_4 = arith.constant 0 : index
    %3 = vector.load %arg3[%c0_3, %c0_4] : memref<1x256xf32, #tpu.memory_space<vmem>>, vector<1x256xf32>
    %4 = vector.broadcast %3 : vector<1x256xf32> to vector<32x256xf32>
    %5 = arith.addf %2, %4 : vector<32x256xf32>
    %c0_5 = arith.constant 0 : index
    %c0_6 = arith.constant 0 : index
    %6 = vector.load %arg4[%c0_5, %c0_6] : memref<32x256xf32, #tpu.memory_space<vmem>>, vector<32x256xf32>
    tpu.vector_store %arg4[%c0_5, %c0_6], %5 {strides = array<i32>} : memref<32x256xf32, #tpu.memory_space<vmem>>, vector<32x256xf32>,
    return
  }
  func.func @transform_0(%arg0: i32) -> (i32, i32) {
    %c0_i32 = arith.constant 0 : i32
    %c0_i32_0 = arith.constant 0 : i32
    return %arg0, %c0_i32 : i32, i32
  }
  func.func @transform_1(%arg0: i32) -> (i32, i32) {
    %c0_i32 = arith.constant 0 : i32
    %c0_i32_0 = arith.constant 0 : i32
    %c0_i32_1 = arith.constant 0 : i32
    return %c0_i32, %c0_i32_0 : i32, i32
  }
  func.func @transform_2(%arg0: i32) -> (i32, i32) {
    %c0_i32 = arith.constant 0 : i32
    %c0_i32_0 = arith.constant 0 : i32
    %c0_i32_1 = arith.constant 0 : i32
    return %c0_i32, %c0_i32_0 : i32, i32
  }
  func.func @transform_3(%arg0: i32) -> (i32, i32) {
    %c0_i32 = arith.constant 0 : i32
    %c0_i32_0 = arith.constant 0 : i32
    return %arg0, %c0_i32 : i32, i32
  }
}

</mosaic_0001>

<bundles_post_ra>
// kernel: tpu_custom_call.1
= control target key start
LH: loop header
LB: loop body
LE: loop exit
PB: predicated region body
PF: predicated region fallthrough
CT: control target
= control target key end

     0   :  { %8 = vsyncpa [#allocation3], 0  ;;  %s488_s0 = inlined_call_operand.hbm [shape: f32[32,256], index: 0, kind: input, shape index: {}]   ;;  %s489_s1 = inlined_call_operand.hbm [shape: f32[256,256], index: 1, kind: input, shape index: {}]   ;;  %s490_s2 = inlined_call_operand.vmem [shape: f32[1,256], index: 2, kind: input, shape index: {}]   ;;  %s491_s3 = inlined_call_operand.hbm [shape: f32[32,256], index: 3, kind: output, shape index: {}]  }
   0x1   :  { %9 = vsyncpa [#allocation6], 0 }
   0x2   :  { %10 = vsyncpa [#allocation4], 0  ;;  %s415_s12 = smov [#allocation2]   ;;  %s343_s16 = scalar_lea.hbm %s488_s0, 1024 }
   0x3   :  { %s16_s13 = sshll.u32 %s415_s12, 4  ;;  %p344_p0 = scmp.ne.s32.totalorder %s488_s0, %s343_s16  ;;  %s17_s13 = int_to_ptr.vmem [resolvable:$true] %s16_s13 }
   0x4   :  { %p347_p1 = scmp.lt.u32.totalorder %s343_s16, %s488_s0 }
   0x6   :  { %p349_p2 = pnand %p347_p1, %p344_p0 }
   0x8   :  { %352 = shalt.err (!%p349_p2)
}
   0x9   :  { %s353_s21 = scalar_lea.vmem %s17_s13, 1024  ;;  %p358_p4 = scmp.lt.s32.totalorder %s17_s13, %s17_s13 }
   0xa   :  { %p354_p3 = scmp.ne.s32.totalorder %s17_s13, %s353_s21  ;;  %p359_p5 = scmp.lt.s32.totalorder %s353_s21, %s353_s21 }
   0xc   :  { %p360_p6 = por %p359_p5, %p358_p4 }
   0xe   :  { %p361_p7 = pnand %p360_p6, %p354_p3 }
  0x10   :  { %364 = shalt.err (!%p361_p7)
}
  0x11   :  { %s416_s22 = smov 256   ;;  %s417_s23 = smov 16  }
  0x12   :  { %22 = dma.hbm_to_vmem [thread:$0]  %s488_s0, 1024, %s17_s13, [#allocation3], %s416_s22, %s416_s22, %s417_s23  }
  0x13   :  { %s418_s26 = smov [#allocation5]   ;;  %s365_s30 = scalar_lea.hbm %s489_s1, 8192 }
  0x14   :  { %s28_s27 = sshll.u32 %s418_s26, 4  ;;  %p366_p8 = scmp.ne.s32.totalorder %s489_s1, %s365_s30  ;;  %s29_s27 = int_to_ptr.vmem [resolvable:$true] %s28_s27 }
  0x15   :  { %p369_p9 = scmp.lt.u32.totalorder %s365_s30, %s489_s1 }
  0x17   :  { %p371_p10 = pnand %p369_p9, %p366_p8 }
  0x19   :  { %374 = shalt.err (!%p371_p10)
}
  0x1a   :  { %s375_s8 = scalar_lea.vmem %s29_s27, 8192  ;;  %p380_p12 = scmp.lt.s32.totalorder %s29_s27, %s29_s27 }
  0x1b   :  { %p376_p11 = scmp.ne.s32.totalorder %s29_s27, %s375_s8  ;;  %p381_p13 = scmp.lt.s32.totalorder %s375_s8, %s375_s8 }
  0x1d   :  { %p382_p0 = por %p381_p13, %p380_p12 }
  0x1f   :  { %p383_p1 = pnand %p382_p0, %p376_p11 }
  0x21   :  { %386 = shalt.err (!%p383_p1)
}
  0x22   :  { %34 = dma.hbm_to_vmem [thread:$0]  %s489_s1, 8192, %s29_s27, [#allocation6], %s416_s22, %s416_s22, %s417_s23  }
  0x23   :  { %409 = dma.done.wait [#allocation3], 1024  }
  0x24   :  { %410 = vsyncadd [#allocation3], 4294966272 }
  0x25   :  { %411 = dma.done.wait [#allocation6], 8192  }
  0x26   :  { %412 = vsyncadd [#allocation6], 4294959104  ;;  %v52_v0 = vld [vmem:[#allocation5 + $0x8] sm:$0xff]  ;;  %v54_v1 = vld [vmem:[#allocation5 + $0x18] sm:$0xff]  ;;  %s419_s11 = smov [#allocation7]  }
  0x27   :  { %v51_v2 = vld [vmem:[#allocation5] sm:$0xff]  ;;  %v242_v3 = vpack.c.bf16 %v54_v1, %v52_v0  ;;  %v53_v4 = vld [vmem:[#allocation5 + $0x10] sm:$0xff]  ;;  %v56_v5 = vld [vmem:[#allocation5 + $0x28] sm:$0xff]  ;;  %s229_s12 = sshll.u32 %s419_s11, 4  ;;  %s230_s12 = int_to_ptr.vmem [resolvable:$true] %s229_s12 }
  0x28   :  { %v58_v6 = vld [vmem:[#allocation5 + $0x38] sm:$0xff]  ;;  %v244_v7 = vpack.c.bf16 %v53_v4, %v51_v2  ;;  %v55_v9 = vld [vmem:[#allocation5 + $0x20] sm:$0xff]  ;;  %v57_v10 = vld [vmem:[#allocation5 + $0x30] sm:$0xff]  ;;  %p392_p3 = scmp.lt.s32.totalorder %s230_s12, %s230_s12 }
  0x29   :  { %v246_v8 = vpack.c.bf16 %v58_v6, %v56_v5  ;;  %v60_v11 = vld [vmem:[#allocation5 + $0x48] sm:$0xff]  ;;  %243 = vmatprep.subr.bf16.mxu0 %v242_v3  ;;  %306 = vmatprep.subr.bf16.mxu1 %v242_v3  ;;  %v62_v12 = vld [vmem:[#allocation5 + $0x58] sm:$0xff]  ;;  %v248_v13 = vpack.c.bf16 %v57_v10, %v55_v9  ;;  %v59_v15 = vld [vmem:[#allocation5 + $0x40] sm:$0xff] }
  0x2a   :  { %245 = vmatpush1.bf16.msra.mxu0 %v244_v7  ;;  %322 = vmatpush1.bf16.msra.mxu1 %v244_v7  ;;  %v250_v14 = vpack.c.bf16 %v62_v12, %v60_v11  ;;  %v61_v16 = vld [vmem:[#allocation5 + $0x50] sm:$0xff]  ;;  %v64_v17 = vld [vmem:[#allocation5 + $0x68] sm:$0xff]  ;;  %v66_v18 = vld [vmem:[#allocation5 + $0x78] sm:$0xff] }
  0x2b   :  { %247 = vmatprep.subr.bf16.mxu0 %v246_v8  ;;  %307 = vmatprep.subr.bf16.mxu1 %v246_v8  ;;  %v252_v19 = vpack.c.bf16 %v61_v16, %v59_v15  ;;  %v254_v20 = vpack.c.bf16 %v66_v18, %v64_v17  ;;  %v63_v21 = vld [vmem:[#allocation5 + $0x60] sm:$0xff]  ;;  %v65_v22 = vld [vmem:[#allocation5 + $0x70] sm:$0xff]  ;;  %v68_v23 = vld [vmem:[#allocation5 + $0x88] sm:$0xff] }
  0x2c   :  { %v70_v24 = vld [vmem:[#allocation5 + $0x98] sm:$0xff]  ;;  %v256_v25 = vpack.c.bf16 %v65_v22, %v63_v21  ;;  %v67_v27 = vld [vmem:[#allocation5 + $0x80] sm:$0xff]  ;;  %v69_v28 = vld [vmem:[#allocation5 + $0x90] sm:$0xff] }
  0x2d   :  { %v258_v26 = vpack.c.bf16 %v70_v24, %v68_v23  ;;  %v72_v29 = vld [vmem:[#allocation5 + $0xa8] sm:$0xff]  ;;  %v74_v30 = vld [vmem:[#allocation5 + $0xb8] sm:$0xff]  ;;  %v260_v31 = vpack.c.bf16 %v69_v28, %v67_v27  ;;  %v71_v33 = vld [vmem:[#allocation5 + $0xa0] sm:$0xff] }
  0x2e   :  { %249 = vmatpush1.bf16.msra.mxu0 %v248_v13  ;;  %323 = vmatpush1.bf16.msra.mxu1 %v248_v13  ;;  %v262_v32 = vpack.c.bf16 %v74_v30, %v72_v29  ;;  %v73_v34 = vld [vmem:[#allocation5 + $0xb0] sm:$0xff]  ;;  %v76_v35 = vld [vmem:[#allocation5 + $0xc8] sm:$0xff]  ;;  %v78_v36 = vld [vmem:[#allocation5 + $0xd8] sm:$0xff] }
  0x2f   :  { %251 = vmatprep.subr.bf16.mxu0 %v250_v14  ;;  %308 = vmatprep.subr.bf16.mxu1 %v250_v14  ;;  %v264_v37 = vpack.c.bf16 %v73_v34, %v71_v33  ;;  %v75_v38 = vld [vmem:[#allocation5 + $0xc0] sm:$0xff]  ;;  %v266_v39 = vpack.c.bf16 %v78_v36, %v76_v35  ;;  %v77_v40 = vld [vmem:[#allocation5 + $0xd0] sm:$0xff]  ;;  %v44_v41 = vld [vmem:[#allocation2 + $0x8] sm:$0xff] }
  0x30   :  { %v48_v42 = vld [vmem:[#allocation2 + $0x28] sm:$0xff]  ;;  %v82_v44 = vld [vmem:[#allocation5 + $0xf8] sm:$0xff]  ;;  %191 = vmatprep.mubr.f32.mxu0 %v44_v41  ;;  %v268_v45 = vpack.c.bf16 %v77_v40, %v75_v38  ;;  %v79_v47 = vld [vmem:[#allocation5 + $0xe0] sm:$0xff]  ;;  %v117_v40 = vlaneseq }
  0x31   :  { %v80_v43 = vld [vmem:[#allocation5 + $0xe8] sm:$0xff]  ;;  %203 = vmatprep.mubr.f32.mxu1 %v48_v42  ;;  %v81_v48 = vld [vmem:[#allocation5 + $0xf0] sm:$0xff]  ;;  %v86_v50 = vld [vmem:[#allocation5 + $0x118] sm:$0xff] }
  0x32   :  { %253 = vmatpush1.bf16.msra.mxu0 %v252_v19  ;;  %324 = vmatpush1.bf16.msra.mxu1 %v252_v19  ;;  %v270_v46 = vpack.c.bf16 %v82_v44, %v80_v43  ;;  %v84_v49 = vld [vmem:[#allocation5 + $0x108] sm:$0xff]  ;;  %v272_v51 = vpack.c.bf16 %v81_v48, %v79_v47  ;;  %v83_v53 = vld [vmem:[#allocation5 + $0x100] sm:$0xff]  ;;  %v85_v54 = vld [vmem:[#allocation5 + $0x110] sm:$0xff]  ;;  %v118_v41 = vshrl.u32 %v117_v40, 7 }
  0x33   :  { %255 = vmatprep.subr.bf16.mxu0 %v254_v20  ;;  %309 = vmatprep.subr.bf16.mxu1 %v254_v20  ;;  %v274_v52 = vpack.c.bf16 %v86_v50, %v84_v49  ;;  %v88_v55 = vld [vmem:[#allocation5 + $0x128] sm:$0xff]  ;;  %v90_v56 = vld [vmem:[#allocation5 + $0x138] sm:$0xff]  ;;  %v276_v57 = vpack.c.bf16 %v85_v54, %v83_v53  ;;  %v87_v59 = vld [vmem:[#allocation5 + $0x120] sm:$0xff] }
  0x34   :  { %v278_v58 = vpack.c.bf16 %v90_v56, %v88_v55  ;;  %v89_v60 = vld [vmem:[#allocation5 + $0x130] sm:$0xff]  ;;  %v92_v61 = vld [vmem:[#allocation5 + $0x148] sm:$0xff]  ;;  %v94_v62 = vld [vmem:[#allocation5 + $0x158] sm:$0xff]  ;;  %v119_v42 = vsub.s32 0, %v118_v41  ;;  %v123_v44 = vsub.s32 1, %v118_v41 }
  0x35   :  { %v280_v63 = vpack.c.bf16 %v89_v60, %v87_v59  ;;  %v282_v0 = vpack.c.bf16 %v94_v62, %v92_v61  ;;  %v91_v1 = vld [vmem:[#allocation5 + $0x140] sm:$0xff]  ;;  %v93_v2 = vld [vmem:[#allocation5 + $0x150] sm:$0xff]  ;;  %v96_v3 = vld [vmem:[#allocation5 + $0x168] sm:$0xff] }
  0x36   :  { %257 = vmatpush1.bf16.msra.mxu0 %v256_v25  ;;  %325 = vmatpush1.bf16.msra.mxu1 %v256_v25  ;;  %v98_v4 = vld [vmem:[#allocation5 + $0x178] sm:$0xff]  ;;  %v284_v5 = vpack.c.bf16 %v93_v2, %v91_v1  ;;  %v95_v7 = vld [vmem:[#allocation5 + $0x160] sm:$0xff]  ;;  %v97_v8 = vld [vmem:[#allocation5 + $0x170] sm:$0xff] }
  0x37   :  { %259 = vmatprep.subr.bf16.mxu0 %v258_v26  ;;  %310 = vmatprep.subr.bf16.mxu1 %v258_v26  ;;  %v286_v6 = vpack.c.bf16 %v98_v4, %v96_v3  ;;  %v100_v9 = vld [vmem:[#allocation5 + $0x188] sm:$0xff]  ;;  %v102_v10 = vld [vmem:[#allocation5 + $0x198] sm:$0xff]  ;;  %v288_v11 = vpack.c.bf16 %v97_v8, %v95_v7  ;;  %v99_v13 = vld [vmem:[#allocation5 + $0x180] sm:$0xff] }
  0x38   :  { %v290_v12 = vpack.c.bf16 %v102_v10, %v100_v9  ;;  %v101_v14 = vld [vmem:[#allocation5 + $0x190] sm:$0xff]  ;;  %v104_v15 = vld [vmem:[#allocation5 + $0x1a8] sm:$0xff]  ;;  %v106_v16 = vld [vmem:[#allocation5 + $0x1b8] sm:$0xff] }
  0x39   :  { %v292_v17 = vpack.c.bf16 %v101_v14, %v99_v13  ;;  %v294_v18 = vpack.c.bf16 %v106_v16, %v104_v15  ;;  %v103_v19 = vld [vmem:[#allocation5 + $0x1a0] sm:$0xff]  ;;  %v105_v20 = vld [vmem:[#allocation5 + $0x1b0] sm:$0xff]  ;;  %v108_v21 = vld [vmem:[#allocation5 + $0x1c8] sm:$0xff] }
  0x3a   :  { %261 = vmatpush1.bf16.msra.mxu0 %v260_v31  ;;  %326 = vmatpush1.bf16.msra.mxu1 %v260_v31  ;;  %v110_v22 = vld [vmem:[#allocation5 + $0x1d8] sm:$0xff]  ;;  %v296_v23 = vpack.c.bf16 %v105_v20, %v103_v19  ;;  %v107_v25 = vld [vmem:[#allocation5 + $0x1c0] sm:$0xff]  ;;  %v109_v26 = vld [vmem:[#allocation5 + $0x1d0] sm:$0xff] }
  0x3b   :  { %263 = vmatprep.subr.bf16.mxu0 %v262_v32  ;;  %311 = vmatprep.subr.bf16.mxu1 %v262_v32  ;;  %v298_v24 = vpack.c.bf16 %v110_v22, %v108_v21  ;;  %v112_v27 = vld [vmem:[#allocation5 + $0x1e8] sm:$0xff]  ;;  %v114_v28 = vld [vmem:[#allocation5 + $0x1f8] sm:$0xff]  ;;  %v300_v29 = vpack.c.bf16 %v109_v26, %v107_v25  ;;  %v111_v31 = vld [vmem:[#allocation5 + $0x1e0] sm:$0xff] }
  0x3c   :  { %v302_v30 = vpack.c.bf16 %v114_v28, %v112_v27  ;;  %v113_v32 = vld [vmem:[#allocation5 + $0x1f0] sm:$0xff]  ;;  %v43_v34 = vld [vmem:[#allocation2] sm:$0xff]  ;;  %v46_v36 = vld [vmem:[#allocation2 + $0x18] sm:$0xff] }
  0x3d   :  { %v304_v33 = vpack.c.bf16 %v113_v32, %v111_v31  ;;  %v47_v35 = vld [vmem:[#allocation2 + $0x20] sm:$0xff]  ;;  %v45_v38 = vld [vmem:[#allocation2 + $0x10] sm:$0xff] }
  0x3e   :  { %265 = vmatpush1.bf16.msra.mxu0 %v264_v37  ;;  %327 = vmatpush1.bf16.msra.mxu1 %v264_v37  ;;  %v50_v37 = vld [vmem:[#allocation2 + $0x38] sm:$0xff]  ;;  %v115_v43 = vld [vmem:[%s490_s2] sm:$0x3]  ;;  %s387_s2 = scalar_lea.vmem %s230_s12, 1024 }
  0x3f   :  { %267 = vmatprep.subr.bf16.mxu0 %v266_v39  ;;  %312 = vmatprep.subr.bf16.mxu1 %v266_v39  ;;  %v49_v39 = vld [vmem:[#allocation2 + $0x30] sm:$0xff]  ;;  %p388_p2 = scmp.ne.s32.totalorder %s230_s12, %s387_s2  ;;  %p393_p4 = scmp.lt.s32.totalorder %s387_s2, %s387_s2 }
  0x41   :  { %p394_p5 = por %p393_p4, %p392_p3 }
  0x42   :  { %269 = vmatpush1.bf16.msra.mxu0 %v268_v45  ;;  %328 = vmatpush1.bf16.msra.mxu1 %v268_v45  ;;  %v120_v45 = vrot.slane %v115_v43, %v119_v42 }
  0x43   :  { %271 = vmatprep.subr.bf16.mxu0 %v270_v46  ;;  %313 = vmatprep.subr.bf16.mxu1 %v270_v46  ;;  %v124_v46 = vrot.slane %v115_v43, %v123_v44  ;;  %p395_p6 = pnand %p394_p5, %p388_p2 }
  0x46   :  { %273 = vmatpush1.bf16.msra.mxu0 %v272_v51  ;;  %329 = vmatpush1.bf16.msra.mxu1 %v272_v51 }
  0x47   :  { %275 = vmatprep.subr.bf16.mxu0 %v274_v52  ;;  %314 = vmatprep.subr.bf16.mxu1 %v274_v52 }
  0x4a   :  { %277 = vmatpush1.bf16.msra.mxu0 %v276_v57  ;;  %330 = vmatpush1.bf16.msra.mxu1 %v276_v57 }
  0x4b   :  { %279 = vmatprep.subr.bf16.mxu0 %v278_v58  ;;  %315 = vmatprep.subr.bf16.mxu1 %v278_v58 }
  0x4e   :  { %281 = vmatpush1.bf16.msra.mxu0 %v280_v63  ;;  %331 = vmatpush1.bf16.msra.mxu1 %v280_v63 }
  0x4f   :  { %283 = vmatprep.subr.bf16.mxu0 %v282_v0  ;;  %316 = vmatprep.subr.bf16.mxu1 %v282_v0 }
  0x52   :  { %285 = vmatpush1.bf16.msra.mxu0 %v284_v5  ;;  %332 = vmatpush1.bf16.msra.mxu1 %v284_v5 }
  0x53   :  { %287 = vmatprep.subr.bf16.mxu0 %v286_v6  ;;  %317 = vmatprep.subr.bf16.mxu1 %v286_v6 }
  0x56   :  { %289 = vmatpush1.bf16.msra.mxu0 %v288_v11  ;;  %333 = vmatpush1.bf16.msra.mxu1 %v288_v11 }
  0x57   :  { %291 = vmatprep.subr.bf16.mxu0 %v290_v12  ;;  %318 = vmatprep.subr.bf16.mxu1 %v290_v12 }
  0x5a   :  { %293 = vmatpush1.bf16.msra.mxu0 %v292_v17  ;;  %334 = vmatpush1.bf16.msra.mxu1 %v292_v17 }
  0x5b   :  { %295 = vmatprep.subr.bf16.mxu0 %v294_v18  ;;  %319 = vmatprep.subr.bf16.mxu1 %v294_v18 }
  0x5e   :  { %297 = vmatpush1.bf16.msra.mxu0 %v296_v23  ;;  %335 = vmatpush1.bf16.msra.mxu1 %v296_v23 }
  0x5f   :  { %299 = vmatprep.subr.bf16.mxu0 %v298_v24  ;;  %320 = vmatprep.subr.bf16.mxu1 %v298_v24 }
  0x62   :  { %301 = vmatpush1.bf16.msra.mxu0 %v300_v29  ;;  %336 = vmatpush1.bf16.msra.mxu1 %v300_v29 }
  0x63   :  { %303 = vmatprep.subr.bf16.mxu0 %v302_v30  ;;  %321 = vmatprep.subr.bf16.mxu1 %v302_v30 }
  0x66   :  { %305 = vmatpush1.bf16.msra.mxu0 %v304_v33  ;;  %337 = vmatpush1.bf16.msra.mxu1 %v304_v33 }
  0x69   :  { %192 = vmatmul.mubr.f32.vlgmr.msra.gmra.mrb[0].mxu0 %v43_v34  ;;  %204 = vmatmul.mubr.f32.vlgmr.msra.gmra.mrb[0].mxu1 %v47_v35 }
  0x6a   :  { %197 = vmatprep.mubr.f32.mxu0 %v46_v36  ;;  %209 = vmatprep.mubr.f32.mxu1 %v50_v37 }
  0x6d   :  { %198 = vmatmul.mubr.f32.gmra.mrb[2].mxu0 %v45_v38  ;;  %210 = vmatmul.mubr.f32.gmra.mrb[2].mxu1 %v49_v39 }
 0x13c   :  { %v193_v47 = vpop.f32.mrb[0].mxu0  ;;  %v205_v48 = vpop.f32.mrb[0].mxu1 }
 0x13d   :  { %v194_v49 = vadd.f32 %v193_v47, %v120_v45  ;;  %v206_v50 = vadd.f32 %v205_v48, %v120_v45  ;;  %v195_v51 = vpop.f32.mrb[1].mxu0  ;;  %v207_v52 = vpop.f32.mrb[1].mxu1 }
 0x13e   :  { %v196_v53 = vadd.f32 %v195_v51, %v124_v46  ;;  %v208_v54 = vadd.f32 %v207_v52, %v124_v46 }
 0x13f   :  { %216 = vst [vmem:[#allocation7] sm:$0xff] %v194_v49  ;;  %220 = vst [vmem:[#allocation7 + $0x20] sm:$0xff] %v206_v50 }
 0x140   :  { %217 = vst [vmem:[#allocation7 + $0x8] sm:$0xff] %v196_v53  ;;  %221 = vst [vmem:[#allocation7 + $0x28] sm:$0xff] %v208_v54  ;;  %v199_v55 = vpop.f32.mrb[2].mxu0  ;;  %v211_v56 = vpop.f32.mrb[2].mxu1 }
 0x141   :  { %v200_v57 = vadd.f32 %v199_v55, %v120_v45  ;;  %v212_v58 = vadd.f32 %v211_v56, %v120_v45  ;;  %v201_v59 = vpop.f32.mrb[3].mxu0  ;;  %v213_v60 = vpop.f32.mrb[3].mxu1 }
 0x142   :  { %v202_v61 = vadd.f32 %v201_v59, %v124_v46  ;;  %v214_v62 = vadd.f32 %v213_v60, %v124_v46 }
 0x143   :  { %218 = vst [vmem:[#allocation7 + $0x10] sm:$0xff] %v200_v57  ;;  %222 = vst [vmem:[#allocation7 + $0x30] sm:$0xff] %v212_v58 }
 0x144   :  { %219 = vst [vmem:[#allocation7 + $0x18] sm:$0xff] %v202_v61  ;;  %223 = vst [vmem:[#allocation7 + $0x38] sm:$0xff] %v214_v62 }
 0x145   :  { %398 = shalt.err (!%p395_p6)
}
 0x146   :  { %s399_s15 = scalar_lea.hbm %s491_s3, 1024 }
 0x147   :  { %p400_p7 = scmp.ne.s32.totalorder %s491_s3, %s399_s15  ;;  %p403_p8 = scmp.lt.u32.totalorder %s399_s15, %s491_s3 }
 0x149   :  { %p405_p9 = pnand %p403_p8, %p400_p7 }
 0x14b   :  { %408 = shalt.err (!%p405_p9)
}
 0x14c   :  { %235 = dma.vmem_to_hbm [thread:$0]  %s230_s12, 1024, %s491_s3, [#allocation4], %s416_s22, %s416_s22, %s417_s23  }
 0x14d   :  { %413 = dma.done.wait [#allocation4], 1024  }
 0x14e   :  { %414 = vsyncadd [#allocation4], 4294966272 }
 0x14f   :  { %239 = vsyncpa [#allocation3], 1 }
 0x150   :  { %240 = vsyncpa [#allocation6], 1 }
 0x151   :  { %241 = vsyncpa [#allocation4], 1 }

</bundles_post_ra>
